<compile_context>
chip_gen: v7x
topology: tpu7x:2x2x1
jax: 0.10.0
libtpu: 0.0.40
codegen_flags: <defaults>
</compile_context>

<pallas_src>
import math

import jax
import jax.numpy as jnp
from jax.experimental import pallas as pl
from jax.experimental.pallas import tpu as pltpu


def _scale_kernel(x_ref, s_ref, o_ref):
    """Mem-bound elementwise scale.

    x_ref : VMEM (TB, C) tile of lane-packed inputs
    s_ref : VMEM (SB, C) resident scale tile (SB == 8 or SB == TB)
    o_ref : VMEM (TB, C) output tile
    """
    x = x_ref[...]
    s = s_ref[...]
    if s.shape[0] != x.shape[0]:
        # Replicate the 8-row resident scale tile along sublanes to cover the
        # row tile (shapes are static; concat is cheap vs. the HBM streams).
        reps = x.shape[0] // s.shape[0]
        s = jnp.concatenate([s] * reps, axis=0)
    o_ref[...] = x * s


def _vmem_capacity_bytes():
    try:
        return int(pltpu.get_tpu_info().vmem_capacity_bytes)
    except Exception:
        return 64 << 20  # conservative: v7x per-TensorCore VMEM


def _pack_layout(B, NF, max_lanes=4096):
    """Choose a lane-dense (R, C) view of the flattened (B, NF) data.

    Returns (R, C, reps) with R*C == B*NF and C == reps*NF, so the per-batch
    scale row (period NF) tiles every packed row exactly `reps` times."""
    if NF % 128 == 0:
        return B, NF, 1
    k = 128 // math.gcd(NF, 128)          # smallest k with (k * NF) % 128 == 0
    if B % k == 0 and k * NF <= max_lanes:
        return B // k, k * NF, k
    # Fallback: full-extent last dim (legal block; stores may be lane-masked).
    return B, NF, 1


def _choose_row_tile(R, row_bytes, target_bytes):
    """Rows per grid step: multiple of 8 (or full R); >= 2 steps when R > 8."""
    if R <= 8:
        return R
    tb_target = max(8, (target_bytes // max(row_bytes, 1)) // 8 * 8)
    half = ((-(-R // 2)) + 7) // 8 * 8    # round_up(ceil(R/2), 8) -> grid >= 2
    return max(8, min(tb_target, half))


def power_reallocate(inputs, weight1, weight2=None, seq_order=0, *,
                     numb_block=None, seq_reloc=1, tile_target_bytes=None):
    """Forward pass of Power_reallocate.

    inputs   : (B, N, F) f32
    weight1  : (N, 1)    f32   (N == args.numb_block in the original module)
    weight2  : (L, 1)    f32   (L = parity_pb + block_size); used iff seq_reloc == 1
    seq_order: int scalar
    """
    B, N, F = inputs.shape
    assert weight1.shape[0] == N, "weight1 rows must match inputs.shape[1]"
    if numb_block is None:
        # In the original module weight1 has exactly args.numb_block rows.
        numb_block = weight1.shape[0]

    # ---- loop-invariant normalization, hoisted; done once in f32 ----
    w1sq = (weight1 * weight1).astype(jnp.float32)
    wt1 = jnp.sqrt(w1sq * (numb_block / jnp.sum(w1sq)))          # (N, 1)
    scale = wt1
    if seq_reloc == 1:
        L = weight2.shape[0]
        w2sq = (weight2 * weight2).astype(jnp.float32)
        wt2 = jnp.sqrt(w2sq * (L / jnp.sum(w2sq)))               # (L, 1)
        scale = scale * wt2[seq_order]                           # scalar factor

    # ---- lane-dense layout selection ----
    NF = N * F
    R, C, reps = _pack_layout(B, NF)
    x2d = inputs.reshape(R, C)
    itemsize = x2d.dtype.itemsize

    # ---- generation-aware tile sizing ----
    vmem_cap = _vmem_capacity_bytes()
    if tile_target_bytes is None:
        # in + out, double-buffered => 4x tile; keep under ~half of physical VMEM.
        tile_target_bytes = min(8 << 20, vmem_cap // 8)
    TB = _choose_row_tile(R, C * itemsize, tile_target_bytes)
    SB = 8 if TB % 8 == 0 else TB

    # Scale tile: per-batch scale row flattened, tiled across the packed lanes,
    # replicated to a full sublane tile (kept in f32 until the final cast).
    scale_flat = jnp.broadcast_to(scale, (N, F)).reshape(NF)
    scale_row = jnp.tile(scale_flat, reps).reshape(1, C)
    scale_blk = jnp.broadcast_to(scale_row, (SB, C)).astype(inputs.dtype)

    grid = (pl.cdiv(R, TB),)
    tile_bytes = TB * C * itemsize
    vmem_limit = int(min(vmem_cap,
                         max(32 << 20,
                             4 * tile_bytes + 2 * SB * C * itemsize + (2 << 20))))

    out2d = pl.pallas_call(
        _scale_kernel,
        out_shape=jax.ShapeDtypeStruct((R, C), inputs.dtype),
        grid_spec=pl.GridSpec(
            grid=grid,
            in_specs=[
                pl.BlockSpec((TB, C), lambda i: (i, 0)),   # input row tile
                pl.BlockSpec((SB, C), lambda i: (0, 0)),   # resident scale tile
            ],
            out_specs=pl.BlockSpec((TB, C), lambda i: (i, 0)),
        ),
        compiler_params=pltpu.CompilerParams(
            dimension_semantics=("parallel",),
            vmem_limit_bytes=vmem_limit),
    )(x2d, scale_blk)

    return out2d.reshape(B, N, F)


def _reference(x, w1, w2, so, numb_block, seq_reloc=1):
    wt1 = jnp.sqrt(w1 ** 2 * (numb_block / jnp.sum(w1 ** 2)))
    out = x * wt1
    if seq_reloc == 1:
        L = w2.shape[0]
        wt2 = jnp.sqrt(w2 ** 2 * (L / jnp.sum(w2 ** 2)))
        out = out * wt2[so]
    return out


if __name__ == "__main__":
    key = jax.random.PRNGKey(0)
    k_in, k_w1, k_w2, k_a, k_b, k_c, k_d = jax.random.split(key, 7)

    # args: numb_block=8, block_size=6, parity_pb=2, seq_reloc=1
    B, N, F = 2, 8, 4
    parity_pb, block_size = 2, 6
    L = parity_pb + block_size
    seq_order = 3

    # Module __init__: uniform_(1.0, 1.0) -> all ones (deterministic).
    weight1 = jnp.ones((N, 1), jnp.float32)
    weight2 = jnp.ones((L, 1), jnp.float32)
    inputs = jax.random.normal(k_in, (B, N, F), dtype=jnp.float32)

    # 1) unit weights, small batch (fallback layout, single tile)
    out = power_reallocate(inputs, weight1, weight2, seq_order)
    jax.block_until_ready(out)
    assert jnp.allclose(out, _reference(inputs, weight1, weight2, seq_order, N),
                        atol=1e-5), "mismatch (unit weights)"

    # 2) non-trivial weights to exercise the normalization math
    w1r = jax.random.uniform(k_w1, (N, 1), jnp.float32, 0.5, 1.5)
    w2r = jax.random.uniform(k_w2, (L, 1), jnp.float32, 0.5, 1.5)
    out2 = power_reallocate(inputs, w1r, w2r, seq_order)
    jax.block_until_ready(out2)
    assert jnp.allclose(out2, _reference(inputs, w1r, w2r, seq_order, N),
                        atol=1e-5), "mismatch (random weights)"

    # 3) lane-packed layout: B=16, NF=32 -> packed view (4, 128)
    xa = jax.random.normal(k_a, (16, N, F), dtype=jnp.float32)
    out3 = power_reallocate(xa, w1r, w2r, seq_order)
    jax.block_until_ready(out3)
    assert jnp.allclose(out3, _reference(xa, w1r, w2r, seq_order, N),
                        atol=1e-5), "mismatch (lane-packed)"

    # 4) lane-packed + multi-step grid: B=64 -> (16, 128), TB=8, grid=2
    xb = jax.random.normal(k_b, (64, N, F), dtype=jnp.float32)
    out4 = power_reallocate(xb, w1r, w2r, seq_order, tile_target_bytes=4096)
    jax.block_until_ready(out4)
    assert jnp.allclose(out4, _reference(xb, w1r, w2r, seq_order, N),
                        atol=1e-5), "mismatch (packed, tiled grid)"

    # 5) lane-packed, TB (16) > scale tile (8): exercises in-kernel replication
    xc = jax.random.normal(k_c, (128, N, F), dtype=jnp.float32)
    out5 = power_reallocate(xc, w1r, w2r, seq_order)
    jax.block_until_ready(out5)
    assert jnp.allclose(out5, _reference(xc, w1r, w2r, seq_order, N),
                        atol=1e-5), "mismatch (sublane-replicated scale)"

    # 6) fallback layout with a remainder row tile: B=10 (not divisible by 4)
    xd = jax.random.normal(k_d, (10, N, F), dtype=jnp.float32)
    out6 = power_reallocate(xd, w1r, w2r, seq_order, tile_target_bytes=1024)
    jax.block_until_ready(out6)
    assert jnp.allclose(out6, _reference(xd, w1r, w2r, seq_order, N),
                        atol=1e-5), "mismatch (remainder tile)"

    # 7) seq_reloc == 0 path (weight2 factor skipped)
    out7 = power_reallocate(inputs, w1r, w2r, seq_order, seq_reloc=0)
    jax.block_until_ready(out7)
    assert jnp.allclose(out7, _reference(inputs, w1r, w2r, seq_order, N, seq_reloc=0),
                        atol=1e-5), "mismatch (seq_reloc=0)"

    print("KERNEL_OK")
</pallas_src>

<mosaic_0001>
module attributes {stable_mosaic.version = 11 : i64} {
  func.func @_scale_kernel(%arg0: i32, %arg1: memref<2x32xf32, #tpu.memory_space<vmem>>, %arg2: memref<2x32xf32, #tpu.memory_space<vmem>>, %arg3: memref<2x32xf32, #tpu.memory_space<vmem>>) attributes {dimension_semantics = [#tpu.dimension_semantics<parallel>], iteration_bounds = array<i64: 1>, scalar_prefetch = 0 : i64, scratch_operands = 0 : i64, tpu.core_type = #tpu.core_type<tc>, window_params = [{transform_indices = @transform_0, window_bounds = array<i64: 2, 32>}, {pipeline_mode = #tpu.pipeline_mode<synchronous>, transform_indices = @transform_1, window_bounds = array<i64: 2, 32>}, {transform_indices = @transform_2, window_bounds = array<i64: 2, 32>}]} {
    %c0 = arith.constant 0 : index
    %c0_0 = arith.constant 0 : index
    %0 = vector.load %arg1[%c0, %c0_0] : memref<2x32xf32, #tpu.memory_space<vmem>>, vector<2x32xf32>
    %c0_1 = arith.constant 0 : index
    %c0_2 = arith.constant 0 : index
    %1 = vector.load %arg2[%c0_1, %c0_2] : memref<2x32xf32, #tpu.memory_space<vmem>>, vector<2x32xf32>
    %2 = arith.mulf %0, %1 : vector<2x32xf32>
    %c0_3 = arith.constant 0 : index
    %c0_4 = arith.constant 0 : index
    %3 = vector.load %arg3[%c0_3, %c0_4] : memref<2x32xf32, #tpu.memory_space<vmem>>, vector<2x32xf32>
    tpu.vector_store %arg3[%c0_3, %c0_4], %2 {strides = array<i32>} : memref<2x32xf32, #tpu.memory_space<vmem>>, vector<2x32xf32>,
    return
  }
  func.func @transform_0(%arg0: i32) -> (i32, i32) {
    %c0_i32 = arith.constant 0 : i32
    %c0_i32_0 = arith.constant 0 : i32
    return %arg0, %c0_i32 : i32, i32
  }
  func.func @transform_1(%arg0: i32) -> (i32, i32) {
    %c0_i32 = arith.constant 0 : i32
    %c0_i32_0 = arith.constant 0 : i32
    %c0_i32_1 = arith.constant 0 : i32
    return %c0_i32, %c0_i32_0 : i32, i32
  }
  func.func @transform_2(%arg0: i32) -> (i32, i32) {
    %c0_i32 = arith.constant 0 : i32
    %c0_i32_0 = arith.constant 0 : i32
    return %arg0, %c0_i32 : i32, i32
  }
}

</mosaic_0001>

<bundles_post_ra>
// kernel: tpu_custom_call.1
= control target key start
LH: loop header
LB: loop body
LE: loop exit
PB: predicated region body
PF: predicated region fallthrough
CT: control target
= control target key end

     0   :  { %7 = vsyncpa [#allocation3], 0  ;;  %s138_s0 = inlined_call_operand.hbm [shape: f32[2,32], index: 0, kind: input, shape index: {}]   ;;  %s139_s1 = inlined_call_operand.vmem [shape: f32[2,32], index: 1, kind: input, shape index: {}]   ;;  %s140_s2 = inlined_call_operand.hbm [shape: f32[2,32], index: 2, kind: output, shape index: {}]  }
   0x1   :  { %8 = vsyncpa [#allocation4], 0  ;;  %s94_s9 = smov [#allocation2]   ;;  %s46_s13 = scalar_lea.hbm %s138_s0, 32 }
   0x2   :  { %s15_s10 = sshll.u32 %s94_s9, 4  ;;  %p47_p0 = scmp.ne.s32.totalorder %s138_s0, %s46_s13  ;;  %s16_s10 = int_to_ptr.vmem [resolvable:$true] %s15_s10 }
   0x3   :  { %p50_p1 = scmp.lt.u32.totalorder %s46_s13, %s138_s0 }
   0x5   :  { %p52_p2 = pnand %p50_p1, %p47_p0 }
   0x7   :  { %55 = shalt.err (!%p52_p2)
}
   0x8   :  { %s56_s18 = scalar_lea.vmem %s16_s10, 32  ;;  %p61_p4 = scmp.lt.s32.totalorder %s16_s10, %s16_s10 }
   0x9   :  { %p57_p3 = scmp.ne.s32.totalorder %s16_s10, %s56_s18  ;;  %p62_p5 = scmp.lt.s32.totalorder %s56_s18, %s56_s18 }
   0xb   :  { %p63_p6 = por %p62_p5, %p61_p4 }
   0xd   :  { %p64_p7 = pnand %p63_p6, %p57_p3 }
   0xf   :  { %67 = shalt.err (!%p64_p7)
}
  0x10   :  { %18 = dma.hbm_to_vmem [thread:$0]  %s138_s0, 32, %s16_s10, [#allocation3]  }
  0x11   :  { %90 = dma.done.wait [#allocation3], 32  }
  0x12   :  { %91 = vsyncadd [#allocation3], 4294967264  ;;  %s95_s21 = smov [#allocation5]   ;;  %v24_v0 = vld [vmem:[#allocation2] sm:$0x3]  ;;  %vm27_vm0 = vcmask 254976  }
  0x13   :  { %s35_s22 = sshll.u32 %s95_s21, 4  ;;  %v25_v1 = vld [vmem:[%s139_s1] sm:$0x3]  ;;  %s36_s22 = int_to_ptr.vmem [resolvable:$true] %s35_s22 }
  0x14   :  { %v26_v2 = vmul.f32 %v25_v1, %v24_v0  ;;  %s68_s25 = scalar_lea.vmem %s36_s22, 32  ;;  %p73_p9 = scmp.lt.s32.totalorder %s36_s22, %s36_s22 }
  0x15   :  { %p69_p8 = scmp.ne.s32.totalorder %s36_s22, %s68_s25  ;;  %p74_p10 = scmp.lt.s32.totalorder %s68_s25, %s68_s25 }
  0x16   :  { %28 = vst.msk [vmem:[#allocation5] sm:$0x3] %vm27_vm0, %v26_v2 }
  0x17   :  { %p75_p11 = por %p74_p10, %p73_p9 }
  0x19   :  { %p76_p12 = pnand %p75_p11, %p69_p8 }
  0x1b   :  { %79 = shalt.err (!%p76_p12)
}
  0x1c   :  { %s80_s27 = scalar_lea.hbm %s140_s2, 32 }
  0x1d   :  { %p81_p13 = scmp.ne.s32.totalorder %s140_s2, %s80_s27  ;;  %p84_p0 = scmp.lt.u32.totalorder %s80_s27, %s140_s2 }
  0x1f   :  { %p86_p1 = pnand %p84_p0, %p81_p13 }
  0x21   :  { %89 = shalt.err (!%p86_p1)
}
  0x22   :  { %38 = dma.vmem_to_hbm [thread:$0]  %s36_s22, 32, %s140_s2, [#allocation4]  }
  0x23   :  { %92 = dma.done.wait [#allocation4], 32  }
  0x24   :  { %93 = vsyncadd [#allocation4], 4294967264 }
  0x25   :  { %42 = vsyncpa [#allocation3], 1 }
  0x26   :  { %43 = vsyncpa [#allocation4], 1 }

</bundles_post_ra>
